<compile_context>
chip_gen: v7x
topology: tpu7x:2x2x1
jax: 0.10.0
libtpu: 0.0.40
codegen_flags: <defaults>
</compile_context>

<pallas_src>
import functools

import jax
import jax.numpy as jnp
from jax import lax
from jax.experimental import pallas as pl
from jax.experimental.pallas import tpu as pltpu

_HEAD_LANES = 8      # fused [pi | v | pad] head width (n_actions + 1 <= 8)
_SUB_CHUNK = 256     # in-kernel row sub-chunk (bounds vreg working set)


def _round_up(x, m):
    return ((x + m - 1) // m) * m


# ---------------------------------------------------------------------------
# Kernel
# ---------------------------------------------------------------------------
def _make_kernel(nchunks, chunk):
    """Kernel over one (tb, d_in) batch tile; tb == nchunks * chunk."""

    def kernel(x_ref, w1_ref, b1_ref, w2_ref, b2_ref, wh_ref, bh_ref, out_ref):
        # Weights/biases are VMEM-resident (same full-array block every step).
        w1 = w1_ref[...]
        b1 = b1_ref[...]
        w2 = w2_ref[...]
        b2 = b2_ref[...]
        wh = wh_ref[...]
        bh = bh_ref[...]

        def body(c, carry):
            r = pl.multiple_of(c * chunk, chunk)
            # fc1 + ReLU  (x cast to the MXU dtype *inside* the kernel)
            x = x_ref[pl.ds(r, chunk), :].astype(w1.dtype)
            h1 = jnp.dot(x, w1, preferred_element_type=jnp.float32)
            h1 = jnp.maximum(h1 + b1, 0.0)                      # (chunk, fc1) f32
            # fc2 + ReLU
            h2 = jnp.dot(h1.astype(w2.dtype), w2,
                         preferred_element_type=jnp.float32)
            h2 = jnp.maximum(h2 + b2, 0.0)                      # (chunk, fc2) f32
            # fused heads: [ pi | v | pad ] -> one (chunk, 8) store
            out_ref[pl.ds(r, chunk), :] = (
                jnp.dot(h2.astype(wh.dtype), wh,
                        preferred_element_type=jnp.float32) + bh)
            return carry

        if nchunks == 1:
            body(0, None)
        else:
            lax.fori_loop(0, nchunks, body, None, unroll=True)

    return kernel


# ---------------------------------------------------------------------------
# One-time parameter preparation (do this at init, NOT per forward call)
# ---------------------------------------------------------------------------
def prepare_params(params, *, use_bf16=True):
    """Fuse pi/v heads into an 8-lane slab and cast matmul weights once."""
    w1, b1 = params["w1"], params["b1"]
    w2, b2 = params["w2"], params["b2"]
    wpi, bpi = params["wpi"], params["bpi"]
    wv, bv = params["wv"], params["bv"]

    n_actions = wpi.shape[1]
    fc2 = w2.shape[1]
    n_head = n_actions + 1
    assert n_head <= _HEAD_LANES, "fused head assumed to fit in 8 lanes"

    w_head = jnp.zeros((fc2, _HEAD_LANES), jnp.float32)
    w_head = w_head.at[:, :n_actions].set(wpi).at[:, n_actions:n_head].set(wv)
    b_head = jnp.zeros((1, _HEAD_LANES), jnp.float32)
    b_head = b_head.at[:, :n_actions].set(bpi).at[:, n_actions:n_head].set(bv)

    mat_dtype = jnp.bfloat16 if use_bf16 else jnp.float32
    return {
        "w1": w1.astype(mat_dtype), "b1": b1,          # biases stay f32 (VPU path)
        "w2": w2.astype(mat_dtype), "b2": b2,
        "wh": w_head.astype(mat_dtype), "bh": b_head,
        "n_actions": n_actions,
    }


# ---------------------------------------------------------------------------
# Forward wrapper
# ---------------------------------------------------------------------------
def _choose_tile(B, batch_tile):
    if B <= _SUB_CHUNK:
        return _round_up(B, 8)                     # single small step
    # Ensure >= 2 grid steps so the "parallel" batch axis shards across
    # v7x's 2 TensorCores; keep the tile a multiple of the sub-chunk.
    half = _round_up(pl.cdiv(B, 2), _SUB_CHUNK)
    return min(_round_up(batch_tile, _SUB_CHUNK), half)


def actor_critic_forward(x, prep, *, batch_tile=1024):
    """x: (B, input_dim) float32.  prep: output of prepare_params.
    Returns (pi, v) float32."""
    B, d_in = x.shape
    n_actions = prep["n_actions"]

    tb = _choose_tile(B, batch_tile)
    b_pad = _round_up(B, tb)
    if b_pad != B:
        # TODO(synk): pad once upstream / batch to a tile multiple to avoid
        # this extra full-array copy in the per-step RL regime.
        x = jnp.pad(x, ((0, b_pad - B), (0, 0)))

    chunk = min(tb, _SUB_CHUNK)
    nchunks = tb // chunk

    # Full-array, VMEM-resident specs for weights/biases (same block each step).
    def resident(a):
        nd = a.ndim
        return pl.BlockSpec(a.shape, lambda i, _nd=nd: (0,) * _nd)

    out = pl.pallas_call(
        _make_kernel(nchunks, chunk),
        out_shape=jax.ShapeDtypeStruct((b_pad, _HEAD_LANES), jnp.float32),
        grid=(b_pad // tb,),
        in_specs=[
            pl.BlockSpec((tb, d_in), lambda i: (i, 0)),   # x: batch-tiled, f32
            resident(prep["w1"]), resident(prep["b1"]),
            resident(prep["w2"]), resident(prep["b2"]),
            resident(prep["wh"]), resident(prep["bh"]),
        ],
        out_specs=pl.BlockSpec((tb, _HEAD_LANES), lambda i: (i, 0)),
        compiler_params=pltpu.CompilerParams(
            dimension_semantics=("parallel",)),
    )(x, prep["w1"], prep["b1"], prep["w2"], prep["b2"],
      prep["wh"], prep["bh"])

    pi = out[:B, :n_actions]
    v = out[:B, n_actions:n_actions + 1]
    return pi, v


# ---------------------------------------------------------------------------
# Init + references
# ---------------------------------------------------------------------------
def init_params(key, input_dim, fc1_dims, fc2_dims, n_actions):
    """Deterministic PyTorch-nn.Linear-style uniform init (synthetic weights)."""
    def linear(k, fan_in, fan_out):
        kw, kb = jax.random.split(k)
        bound = 1.0 / jnp.sqrt(fan_in)
        w = jax.random.uniform(kw, (fan_in, fan_out), jnp.float32, -bound, bound)
        b = jax.random.uniform(kb, (1, fan_out), jnp.float32, -bound, bound)
        return w, b

    k1, k2, k3, k4 = jax.random.split(key, 4)
    w1, b1 = linear(k1, input_dim, fc1_dims)
    w2, b2 = linear(k2, fc1_dims, fc2_dims)
    wpi, bpi = linear(k3, fc2_dims, n_actions)
    wv, bv = linear(k4, fc2_dims, 1)
    return {"w1": w1, "b1": b1, "w2": w2, "b2": b2,
            "wpi": wpi, "bpi": bpi, "wv": wv, "bv": bv}


def reference_forward_f32(x, p):
    """Pure f32 reference of the PyTorch forward semantics."""
    h1 = jnp.maximum(x @ p["w1"] + p["b1"], 0.0)
    h2 = jnp.maximum(h1 @ p["w2"] + p["b2"], 0.0)
    return h2 @ p["wpi"] + p["bpi"], h2 @ p["wv"] + p["bv"]


def reference_forward_matched(x, p, use_bf16):
    """Pure-JAX reference using the same matmul dtypes as the kernel."""
    md = jnp.bfloat16 if use_bf16 else jnp.float32
    dot = lambda a, b: jnp.dot(a.astype(md), b.astype(md),
                               preferred_element_type=jnp.float32)
    h1 = jnp.maximum(dot(x, p["w1"]) + p["b1"], 0.0)
    h2 = jnp.maximum(dot(h1, p["w2"]) + p["b2"], 0.0)
    return dot(h2, p["wpi"]) + p["bpi"], dot(h2, p["wv"]) + p["bv"]


if __name__ == "__main__":
    # Small shapes consistent with the module's __init__:
    #   input_dims=(16,), fc1_dims=64, fc2_dims=32, n_actions=4, batch=8
    B, INPUT_DIM, FC1, FC2, N_ACTIONS = 8, 16, 64, 32, 4

    key = jax.random.PRNGKey(0)
    k_params, k_obs, k_obs2 = jax.random.split(key, 3)
    params = init_params(k_params, INPUT_DIM, FC1, FC2, N_ACTIONS)
    prep = prepare_params(params, use_bf16=True)     # one-time prep (at init)
    obs = jax.random.normal(k_obs, (B, INPUT_DIM), jnp.float32)

    pi, v = actor_critic_forward(obs, prep)
    pi, v = jax.block_until_ready(pi), jax.block_until_ready(v)
    assert pi.shape == (B, N_ACTIONS) and v.shape == (B, 1)

    # Tight check vs. a pure-JAX reference using the same bf16 matmul path.
    pi_m, v_m = reference_forward_matched(obs, params, use_bf16=True)
    assert jnp.allclose(pi, pi_m, atol=1e-4, rtol=1e-4)
    assert jnp.allclose(v, v_m, atol=1e-4, rtol=1e-4)

    # Loose semantic check vs. the full-f32 PyTorch-equivalent forward.
    pi_f, v_f = reference_forward_f32(obs, params)
    assert jnp.allclose(pi, pi_f, atol=5e-2, rtol=5e-2)
    assert jnp.allclose(v, v_f, atol=5e-2, rtol=5e-2)

    # Larger batch exercises padding, multi-grid-step ("parallel" across TCs on
    # v7x) and the in-kernel sub-chunk loop.
    B2 = 600
    obs2 = jax.random.normal(k_obs2, (B2, INPUT_DIM), jnp.float32)
    pi2, v2 = actor_critic_forward(obs2, prep)
    pi2, v2 = jax.block_until_ready(pi2), jax.block_until_ready(v2)
    assert pi2.shape == (B2, N_ACTIONS) and v2.shape == (B2, 1)
    pi2_m, v2_m = reference_forward_matched(obs2, params, use_bf16=True)
    assert jnp.allclose(pi2, pi2_m, atol=1e-4, rtol=1e-4)
    assert jnp.allclose(v2, v2_m, atol=1e-4, rtol=1e-4)

    print("KERNEL_OK")
</pallas_src>

<mosaic_0001>
module attributes {stable_mosaic.version = 11 : i64} {
  func.func @kernel(%arg0: i32, %arg1: memref<8x16xf32, #tpu.memory_space<vmem>>, %arg2: memref<16x64xbf16, #tpu.memory_space<vmem>>, %arg3: memref<1x64xf32, #tpu.memory_space<vmem>>, %arg4: memref<64x32xbf16, #tpu.memory_space<vmem>>, %arg5: memref<1x32xf32, #tpu.memory_space<vmem>>, %arg6: memref<32x8xbf16, #tpu.memory_space<vmem>>, %arg7: memref<1x8xf32, #tpu.memory_space<vmem>>, %arg8: memref<8x8xf32, #tpu.memory_space<vmem>>) attributes {dimension_semantics = [#tpu.dimension_semantics<parallel>], iteration_bounds = array<i64: 1>, scalar_prefetch = 0 : i64, scratch_operands = 0 : i64, tpu.core_type = #tpu.core_type<tc>, window_params = [{transform_indices = @transform_0, window_bounds = array<i64: 8, 16>}, {pipeline_mode = #tpu.pipeline_mode<synchronous>, transform_indices = @transform_1, window_bounds = array<i64: 16, 64>}, {pipeline_mode = #tpu.pipeline_mode<synchronous>, transform_indices = @transform_2, window_bounds = array<i64: 1, 64>}, {pipeline_mode = #tpu.pipeline_mode<synchronous>, transform_indices = @transform_3, window_bounds = array<i64: 64, 32>}, {pipeline_mode = #tpu.pipeline_mode<synchronous>, transform_indices = @transform_4, window_bounds = array<i64: 1, 32>}, {pipeline_mode = #tpu.pipeline_mode<synchronous>, transform_indices = @transform_5, window_bounds = array<i64: 32, 8>}, {pipeline_mode = #tpu.pipeline_mode<synchronous>, transform_indices = @transform_6, window_bounds = array<i64: 1, 8>}, {transform_indices = @transform_7, window_bounds = array<i64: 8, 8>}]} {
    %c0 = arith.constant 0 : index
    %c0_0 = arith.constant 0 : index
    %0 = vector.load %arg2[%c0, %c0_0] : memref<16x64xbf16, #tpu.memory_space<vmem>>, vector<16x64xbf16>
    %c0_1 = arith.constant 0 : index
    %c0_2 = arith.constant 0 : index
    %1 = vector.load %arg3[%c0_1, %c0_2] : memref<1x64xf32, #tpu.memory_space<vmem>>, vector<1x64xf32>
    %c0_3 = arith.constant 0 : index
    %c0_4 = arith.constant 0 : index
    %2 = vector.load %arg4[%c0_3, %c0_4] : memref<64x32xbf16, #tpu.memory_space<vmem>>, vector<64x32xbf16>
    %c0_5 = arith.constant 0 : index
    %c0_6 = arith.constant 0 : index
    %3 = vector.load %arg5[%c0_5, %c0_6] : memref<1x32xf32, #tpu.memory_space<vmem>>, vector<1x32xf32>
    %c0_7 = arith.constant 0 : index
    %c0_8 = arith.constant 0 : index
    %4 = vector.load %arg6[%c0_7, %c0_8] : memref<32x8xbf16, #tpu.memory_space<vmem>>, vector<32x8xbf16>
    %c0_9 = arith.constant 0 : index
    %c0_10 = arith.constant 0 : index
    %5 = vector.load %arg7[%c0_9, %c0_10] : memref<1x8xf32, #tpu.memory_space<vmem>>, vector<1x8xf32>
    %c0_i32 = arith.constant 0 : i32
    %6 = tpu.assume_multiple %c0_i32, 8 : i32
    %7 = arith.index_cast %6 : i32 to index
    %c0_11 = arith.constant 0 : index
    %8 = vector.load %arg1[%7, %c0_11] : memref<8x16xf32, #tpu.memory_space<vmem>>, vector<8x16xf32>
    %9 = arith.truncf %8 : vector<8x16xf32> to vector<8x16xbf16>
    %cst = arith.constant dense<0.000000e+00> : vector<8x64xf32>
    %10 = tpu.matmul %9, %0, %cst {dimension_numbers = #tpu.dot_dimension_numbers<[1], [0], [0], [1], [0, 0, 1, 1], [], []>} : vector<8x16xbf16>, vector<16x64xbf16>, vector<8x64xf32> -> vector<8x64xf32>
    %11 = vector.broadcast %1 : vector<1x64xf32> to vector<8x64xf32>
    %12 = arith.addf %10, %11 : vector<8x64xf32>
    %cst_12 = arith.constant 0.000000e+00 : f32
    %13 = vector.broadcast %cst_12 : f32 to vector<8x64xf32>
    %14 = arith.maximumf %12, %13 : vector<8x64xf32>
    %15 = arith.truncf %14 : vector<8x64xf32> to vector<8x64xbf16>
    %cst_13 = arith.constant dense<0.000000e+00> : vector<8x32xf32>
    %16 = tpu.matmul %15, %2, %cst_13 {dimension_numbers = #tpu.dot_dimension_numbers<[1], [0], [0], [1], [0, 0, 1, 1], [], []>} : vector<8x64xbf16>, vector<64x32xbf16>, vector<8x32xf32> -> vector<8x32xf32>
    %17 = vector.broadcast %3 : vector<1x32xf32> to vector<8x32xf32>
    %18 = arith.addf %16, %17 : vector<8x32xf32>
    %cst_14 = arith.constant 0.000000e+00 : f32
    %19 = vector.broadcast %cst_14 : f32 to vector<8x32xf32>
    %20 = arith.maximumf %18, %19 : vector<8x32xf32>
    %21 = arith.truncf %20 : vector<8x32xf32> to vector<8x32xbf16>
    %cst_15 = arith.constant dense<0.000000e+00> : vector<8x8xf32>
    %22 = tpu.matmul %21, %4, %cst_15 {dimension_numbers = #tpu.dot_dimension_numbers<[1], [0], [0], [1], [0, 0, 1, 1], [], []>} : vector<8x32xbf16>, vector<32x8xbf16>, vector<8x8xf32> -> vector<8x8xf32>
    %23 = vector.broadcast %5 : vector<1x8xf32> to vector<8x8xf32>
    %24 = arith.addf %22, %23 : vector<8x8xf32>
    %25 = arith.index_cast %6 : i32 to index
    %c0_16 = arith.constant 0 : index
    %26 = vector.load %arg8[%25, %c0_16] : memref<8x8xf32, #tpu.memory_space<vmem>>, vector<8x8xf32>
    tpu.vector_store %arg8[%25, %c0_16], %24 {strides = array<i32>} : memref<8x8xf32, #tpu.memory_space<vmem>>, vector<8x8xf32>,
    return
  }
  func.func @transform_0(%arg0: i32) -> (i32, i32) {
    %c0_i32 = arith.constant 0 : i32
    %c0_i32_0 = arith.constant 0 : i32
    return %arg0, %c0_i32 : i32, i32
  }
  func.func @transform_1(%arg0: i32) -> (i32, i32) {
    %c0_i32 = arith.constant 0 : i32
    %c0_i32_0 = arith.constant 0 : i32
    %c0_i32_1 = arith.constant 0 : i32
    return %c0_i32, %c0_i32_0 : i32, i32
  }
  func.func @transform_2(%arg0: i32) -> (i32, i32) {
    %c0_i32 = arith.constant 0 : i32
    %c0_i32_0 = arith.constant 0 : i32
    %c0_i32_1 = arith.constant 0 : i32
    return %c0_i32, %c0_i32_0 : i32, i32
  }
  func.func @transform_3(%arg0: i32) -> (i32, i32) {
    %c0_i32 = arith.constant 0 : i32
    %c0_i32_0 = arith.constant 0 : i32
    %c0_i32_1 = arith.constant 0 : i32
    return %c0_i32, %c0_i32_0 : i32, i32
  }
  func.func @transform_4(%arg0: i32) -> (i32, i32) {
    %c0_i32 = arith.constant 0 : i32
    %c0_i32_0 = arith.constant 0 : i32
    %c0_i32_1 = arith.constant 0 : i32
    return %c0_i32, %c0_i32_0 : i32, i32
  }
  func.func @transform_5(%arg0: i32) -> (i32, i32) {
    %c0_i32 = arith.constant 0 : i32
    %c0_i32_0 = arith.constant 0 : i32
    %c0_i32_1 = arith.constant 0 : i32
    return %c0_i32, %c0_i32_0 : i32, i32
  }
  func.func @transform_6(%arg0: i32) -> (i32, i32) {
    %c0_i32 = arith.constant 0 : i32
    %c0_i32_0 = arith.constant 0 : i32
    %c0_i32_1 = arith.constant 0 : i32
    return %c0_i32, %c0_i32_0 : i32, i32
  }
  func.func @transform_7(%arg0: i32) -> (i32, i32) {
    %c0_i32 = arith.constant 0 : i32
    %c0_i32_0 = arith.constant 0 : i32
    return %arg0, %c0_i32 : i32, i32
  }
}

</mosaic_0001>

<bundles_post_ra>
// kernel: tpu_custom_call.1
= control target key start
LH: loop header
LB: loop body
LE: loop exit
PB: predicated region body
PF: predicated region fallthrough
CT: control target
= control target key end

     0   :  { %v342_v1 = vmov 0.0   ;;  %vm59_vm0 = vcmask 130048   ;;  %vm343_vm1 = vmmov 0   ;;  %s430_s0 = inlined_call_operand.vmem [shape: f32[8,16], index: 0, kind: input, shape index: {}]   ;;  %s431_s1 = inlined_call_operand.vmem [shape: bf16[16,64], index: 1, kind: input, shape index: {}]   ;;  %s432_s2 = inlined_call_operand.vmem [shape: f32[1,64], index: 2, kind: input, shape index: {}]   ;;  %s433_s3 = inlined_call_operand.vmem [shape: bf16[64,32], index: 3, kind: input, shape index: {}]   ;;  %s434_s4 = inlined_call_operand.vmem [shape: f32[1,32], index: 4, kind: input, shape index: {}]   ;;  %s435_s5 = inlined_call_operand.vmem [shape: bf16[32,8], index: 5, kind: input, shape index: {}]   ;;  %s436_s6 = inlined_call_operand.vmem [shape: f32[1,8], index: 6, kind: input, shape index: {}]   ;;  %s437_s7 = inlined_call_operand.hbm [shape: f32[8,8], index: 7, kind: output, shape index: {}]  }
   0x1   :  { %v311_v0 = vld [vmem:[%s431_s1] sm:$0xff]   ;;  %282 = vmatprep.subr.bf16.mxu0 %v342_v1  ;;  %288 = vmatprep.subr.bf16.mxu1 %v342_v1  ;;  %v313_v5 = vld [vmem:[%s433_s3 + $0x8] sm:$0xff]  }
   0x2   :  { %v45_v2 = vld [vmem:[%s430_s0] sm:$0xff]  ;;  %283 = vmatpush3.bf16.msra.mxu0 %v311_v0  ;;  %284 = vmatprep.mubr.msk.bf16.mxu0 %vm343_vm1, %v342_v1 }
   0x3   :  { %v312_v3 = vld [vmem:[%s433_s3] sm:$0xff]   ;;  %v46_v4 = vpack.c.bf16 %v45_v2, %v45_v2  ;;  %296 = vmatprep.mubr.msk.bf16.mxu1 %vm343_vm1, %v342_v1  ;;  %300 = vmatprep.subr.bf16.mxu0 %v342_v1 }
   0x4   :  { %289 = vmatpush3.bf16.msra.mxu1 %v312_v3 }
   0x5   :  { %290 = vmatprep.subr.bf16.mxu1 %v342_v1  ;;  %285 = vmatmul.mubr.msk.bf16.vlgmr.msra.gmra.mrb[0].mxu0 %vm59_vm0, %v46_v4 }
   0x6   :  { %304 = vmatprep.mubr.msk.bf16.mxu0 %vm343_vm1, %v342_v1 }
   0x7   :  { %12 = vsyncpa [#allocation3], 0  ;;  %v314_v6 = vld [vmem:[%s433_s3 + $0x10] sm:$0xff]   ;;  %v315_v7 = vld [vmem:[%s433_s3 + $0x18] sm:$0xff]   ;;  %vm135_vm2 = vcmask 523264   ;;  %vm199_vm3 = vcmask 261120  }
   0x8   :  { %291 = vmatpush3.bf16.msra.mxu1 %v313_v5  ;;  %v316_v8 = vld [vmem:[%s435_s5] sm:$0xff]   ;;  %v317_v17 = vld [vmem:[%s435_s5 + $0x8] sm:$0xff]   ;;  %s344_s19 = smov [#allocation2]   ;;  %vm243_vm4 = vcmask 64512  }
   0x9   :  { %292 = vmatprep.subr.bf16.mxu1 %v342_v1  ;;  %301 = vmatpush3.bf16.msra.mxu0 %v316_v8  ;;  %v259_v9 = vld [vmem:[%s432_s2] ss:$0 sm:$0xff]  ;;  %s251_s5 = sshll.u32 %s344_s19, 4  ;;  %s252_s5 = int_to_ptr.vmem [resolvable:$true] %s251_s5 }
   0xa   :  { %302 = vmatprep.subr.bf16.mxu0 %v342_v1  ;;  %v262_v18 = vld [vmem:[%s434_s4] ss:$0 sm:$0xff]  ;;  %s318_s4 = scalar_lea.vmem %s252_s5, 128  ;;  %p323_p1 = scmp.lt.s32.totalorder %s252_s5, %s252_s5 }
   0xb   :  { %v268_v26 = vld [vmem:[%s436_s6] ss:$0 sm:$0xff]  ;;  %p319_p0 = scmp.ne.s32.totalorder %s252_s5, %s318_s4  ;;  %p324_p2 = scmp.lt.s32.totalorder %s318_s4, %s318_s4 }
   0xc   :  { %293 = vmatpush3.bf16.msra.mxu1 %v314_v6 }
   0xd   :  { %294 = vmatprep.subr.bf16.mxu1 %v342_v1  ;;  %303 = vmatpush3.bf16.msra.mxu0 %v317_v17  ;;  %p325_p3 = por %p324_p2, %p323_p1 }
   0xf   :  { %p326_p4 = pnand %p325_p3, %p319_p0 }
  0x10   :  { %295 = vmatpush3.bf16.msra.mxu1 %v315_v7 }
  0xd8   :  { %v97_v10 = vpop.f32.mrb[0].mxu0 }
  0xd9   :  { %v98_v11 = vadd.f32 %v259_v9, %v97_v10  ;;  %v286_v12 = vpop.f32.mrb[1].mxu0 }
  0xda   :  { %v100_v13 = vpop.f32.mrb[2].mxu0 }
  0xdb   :  { %v103_v14 = vmax.f32 %v98_v11, 0.0  ;;  %v287_v15 = vpop.f32.mrb[3].mxu0 }
  0xdd   :  { %v104_v16 = vpack.c.bf16 %v103_v14, %v103_v14 }
  0xdf   :  { %297 = vmatmul.mubr.msk.bf16.vlgmr.msra.gmra.mrb[0].mxu1 %vm135_vm2, %v104_v16 }
 0x1b2   :  { %v173_v19 = vpop.f32.mrb[0].mxu1 }
 0x1b3   :  { %v174_v20 = vadd.f32 %v262_v18, %v173_v19  ;;  %v298_v21 = vpop.f32.mrb[1].mxu1 }
 0x1b4   :  { %v176_v22 = vpop.f32.mrb[2].mxu1 }
 0x1b5   :  { %v179_v23 = vmax.f32 %v174_v20, 0.0  ;;  %v299_v24 = vpop.f32.mrb[3].mxu1 }
 0x1b7   :  { %v180_v25 = vpack.c.bf16 %v179_v23, %v179_v23 }
 0x1b9   :  { %305 = vmatmul.mubr.msk.bf16.vlgmr.msra.gmra.mrb[4].mxu0 %vm199_vm3, %v180_v25 }
 0x28c   :  { %v237_v27 = vpop.f32.mrb[4].mxu0 }
 0x28d   :  { %v238_v28 = vadd.f32 %v268_v26, %v237_v27  ;;  %v306_v29 = vpop.f32.mrb[5].mxu0 }
 0x28e   :  { %v240_v30 = vpop.f32.mrb[6].mxu0 }
 0x28f   :  { %v307_v31 = vpop.f32.mrb[7].mxu0  ;;  %244 = vst.msk [vmem:[#allocation2] sm:$0xff] %vm243_vm4, %v238_v28 }
 0x290   :  { %329 = shalt.err (!%p326_p4)
}
 0x291   :  { %s330_s6 = scalar_lea.hbm %s437_s7, 128 }
 0x292   :  { %p331_p5 = scmp.ne.s32.totalorder %s437_s7, %s330_s6  ;;  %p334_p6 = scmp.lt.u32.totalorder %s330_s6, %s437_s7 }
 0x294   :  { %p336_p7 = pnand %p334_p6, %p331_p5 }
 0x296   :  { %339 = shalt.err (!%p336_p7)
}
 0x297   :  { %254 = dma.vmem_to_hbm [thread:$0]  %s252_s5, 128, %s437_s7, [#allocation3]  }
 0x298   :  { %340 = dma.done.wait [#allocation3], 128  }
 0x299   :  { %341 = vsyncadd [#allocation3], 4294967168 }
 0x29a   :  { %258 = vsyncpa [#allocation3], 1 }

</bundles_post_ra>
